<compile_context>
chip_gen: v5e
topology: v5e:2x2
jax: 0.10.0
libtpu: 0.0.40
codegen_flags: <defaults>
</compile_context>

<pallas_src>
import functools

import jax
import jax.numpy as jnp
from jax import lax
from jax.experimental import pallas as pl
from jax.experimental.pallas import tpu as pltpu


# ----------------------------------------------------------------------------
# Tile helpers.
# ----------------------------------------------------------------------------
def _row_tile(dim, pref):
    # Tiles along axes where a ragged last block is safe (garbage rows/cols
    # only land in out-of-bounds output that Pallas drops on writeback).
    return dim if dim <= pref else pref


def _div_tile(dim, pref, floor=8):
    # Tiles that must exactly cover the dim (matmul reduction axis, KV axis of
    # the online softmax): largest power-of-two divisor <= pref, else full dim.
    if dim <= pref:
        return dim
    t = pref
    while t >= floor:
        if dim % t == 0:
            return t
        t //= 2
    # TODO(synk): prime-ish dims fall back to a whole-dim block; add explicit
    # masking for ragged reduction/KV blocks if such shapes ever matter.
    return dim


# ----------------------------------------------------------------------------
# Kernel 1: tiled, pipelined matmul (fused QKV projection and output
# projection).  f32 accumulator scratch, init/flush via pl.when.
# ----------------------------------------------------------------------------
def _matmul_kernel(x_ref, w_ref, o_ref, acc_ref):
    @pl.when(pl.program_id(2) == 0)
    def _init():
        acc_ref[...] = jnp.zeros_like(acc_ref)

    acc_ref[...] += jnp.dot(
        x_ref[...], w_ref[...], preferred_element_type=jnp.float32
    )

    @pl.when(pl.program_id(2) == pl.num_programs(2) - 1)
    def _flush():
        o_ref[...] = acc_ref[...].astype(o_ref.dtype)


def pallas_matmul(x, w, *, tm=512, tn=256, tk=256):
    M, K = x.shape
    K2, N = w.shape
    assert K == K2
    tm = _row_tile(M, tm)          # ragged M is safe (cdiv grid below)
    tn = _row_tile(N, tn)          # ragged N is safe
    tk = _div_tile(K, tk, floor=128)  # reduction axis must be exactly covered
    grid = (pl.cdiv(M, tm), pl.cdiv(N, tn), K // tk)
    return pl.pallas_call(
        _matmul_kernel,
        out_shape=jax.ShapeDtypeStruct((M, N), x.dtype),
        grid_spec=pltpu.PrefetchScalarGridSpec(
            num_scalar_prefetch=0,
            grid=grid,
            in_specs=[
                pl.BlockSpec((tm, tk), lambda i, j, k: (i, k)),
                pl.BlockSpec((tk, tn), lambda i, j, k: (k, j)),
            ],
            out_specs=pl.BlockSpec((tm, tn), lambda i, j, k: (i, j)),
            scratch_shapes=[pltpu.VMEM((tm, tn), jnp.float32)],
        ),
        compiler_params=pltpu.CompilerParams(
            dimension_semantics=("parallel", "parallel", "arbitrary")
        ),
    )(x, w)


# ----------------------------------------------------------------------------
# Kernel 2: flash (online-softmax) attention.
# Inputs q, k, v: (B, H, S, dh); grid (B, H, S/tq, S/tkv); m/l/acc in VMEM
# scratch carried across the (innermost, "arbitrary") kv axis.
# ----------------------------------------------------------------------------
def _flash_kernel(q_ref, k_ref, v_ref, o_ref, m_sc, l_sc, acc_sc, *,
                  approx_recip):
    ki = pl.program_id(3)

    @pl.when(ki == 0)
    def _init():
        m_sc[...] = jnp.full_like(m_sc, -jnp.inf)
        l_sc[...] = jnp.zeros_like(l_sc)
        acc_sc[...] = jnp.zeros_like(acc_sc)

    q = q_ref[0, 0]   # (tq, dh); 1/sqrt(dh) already folded into Wq at init
    k = k_ref[0, 0]   # (tkv, dh)
    v = v_ref[0, 0]   # (tkv, dh)

    # Q K^T without materializing k.T: contract the last axes.  f32 scores.
    s = lax.dot_general(
        q, k, (((1,), (1,)), ((), ())), preferred_element_type=jnp.float32
    )                                                           # (tq, tkv)

    m_prev = m_sc[...]
    m_new = jnp.maximum(m_prev, jnp.max(s, axis=-1, keepdims=True))
    alpha = jnp.exp(m_prev - m_new)
    p = jnp.exp(s - m_new)
    l_sc[...] = alpha * l_sc[...] + jnp.sum(p, axis=-1, keepdims=True)
    acc_sc[...] = alpha * acc_sc[...] + lax.dot_general(
        p.astype(v.dtype), v, (((1,), (0,)), ((), ())),
        preferred_element_type=jnp.float32,
    )                                                           # (tq, dh) f32
    m_sc[...] = m_new

    @pl.when(ki == pl.num_programs(3) - 1)
    def _flush():
        inv_l = pl.reciprocal(l_sc[...], approx=approx_recip)   # EUP slot
        o_ref[0, 0] = (acc_sc[...] * inv_l).astype(o_ref.dtype)


def pallas_flash_attention(q, k, v, *, tq=256, tkv=256, approx_recip=True):
    B, H, S, dh = q.shape
    tq = _div_tile(S, tq)
    tkv = _div_tile(S, tkv)
    grid = (B, H, S // tq, S // tkv)
    kernel = functools.partial(_flash_kernel, approx_recip=approx_recip)
    return pl.pallas_call(
        kernel,
        out_shape=jax.ShapeDtypeStruct((B, H, S, dh), q.dtype),
        grid_spec=pltpu.PrefetchScalarGridSpec(
            num_scalar_prefetch=0,
            grid=grid,
            in_specs=[
                pl.BlockSpec((1, 1, tq, dh), lambda b, h, qi, ki: (b, h, qi, 0)),
                pl.BlockSpec((1, 1, tkv, dh), lambda b, h, qi, ki: (b, h, ki, 0)),
                pl.BlockSpec((1, 1, tkv, dh), lambda b, h, qi, ki: (b, h, ki, 0)),
            ],
            out_specs=pl.BlockSpec(
                (1, 1, tq, dh), lambda b, h, qi, ki: (b, h, qi, 0)
            ),
            scratch_shapes=[
                pltpu.VMEM((tq, 1), jnp.float32),    # running max  m
                pltpu.VMEM((tq, 1), jnp.float32),    # running sum  l
                pltpu.VMEM((tq, dh), jnp.float32),   # un-normalized acc
            ],
        ),
        compiler_params=pltpu.CompilerParams(
            dimension_semantics=("parallel", "parallel", "parallel", "arbitrary")
        ),
    )(q, k, v)


# ----------------------------------------------------------------------------
# Wrapper: full MHSA forward.
# ----------------------------------------------------------------------------
def mhsa_forward(x, params, heads, *, compute_dtype=jnp.bfloat16,
                 approx_recip=True):
    # layout: x (B, S, D); Wqkv: (D, 3*hidden) with scale folded into the Wq
    # columns; Wo: (hidden, D)
    B, S, D = x.shape
    Wqkv, Wo = params["Wqkv"], params["Wo"]
    hidden = Wqkv.shape[1] // 3
    assert hidden % heads == 0
    dh = hidden // heads

    if compute_dtype is not None:  # bf16 default → full MXU rate, half HBM
        x, Wqkv, Wo = (t.astype(compute_dtype) for t in (x, Wqkv, Wo))

    # Fused Q/K/V projection: one tiled matmul, one HBM read of x.
    qkv = pallas_matmul(x.reshape(B * S, D), Wqkv)            # (B*S, 3*hidden)

    # Head split: (B, S, 3, H, dh) -> (3, B, H, S, dh).  One XLA pass; tiny
    # next to the matmuls at flash-relevant S.
    qkv = qkv.reshape(B, S, 3, heads, dh).transpose(2, 0, 3, 1, 4)
    q, k, v = qkv[0], qkv[1], qkv[2]                          # (B, H, S, dh)

    attn = pallas_flash_attention(q, k, v, approx_recip=approx_recip)

    # Head merge, then output projection.
    attn = attn.transpose(0, 2, 1, 3).reshape(B * S, hidden)
    out = pallas_matmul(attn, Wo)                             # (B*S, D)
    return out.reshape(B, S, D)


def init_params(key, dims, hidden_dims, heads, dtype=jnp.float32):
    assert hidden_dims % heads == 0
    dh = hidden_dims // heads
    kq, kk, kv, ko = jax.random.split(key, 4)
    s_in = 1.0 / float(dims) ** 0.5
    s_hid = 1.0 / float(hidden_dims) ** 0.5
    wq = jax.random.normal(kq, (dims, hidden_dims)) * s_in
    wk = jax.random.normal(kk, (dims, hidden_dims)) * s_in
    wv = jax.random.normal(kv, (dims, hidden_dims)) * s_in
    wo = jax.random.normal(ko, (hidden_dims, dims)) * s_hid
    # Fold the 1/sqrt(dh) attention scale into Wq once at init (zero runtime
    # cost; kernels never multiply by scale).
    wq = wq * (1.0 / float(dh) ** 0.5)
    return {
        "Wqkv": jnp.concatenate([wq, wk, wv], axis=1).astype(dtype),
        "Wo": wo.astype(dtype),
    }


# ----------------------------------------------------------------------------
# Pure-JAX reference (scale is already folded into Wq, so no extra divide).
# ----------------------------------------------------------------------------
def mhsa_reference(x, params, heads):
    B, S, D = x.shape
    Wqkv, Wo = params["Wqkv"], params["Wo"]
    hidden = Wqkv.shape[1] // 3
    dh = hidden // heads
    qkv = x.reshape(B * S, D) @ Wqkv
    q, k, v = jnp.split(qkv, 3, axis=-1)

    def split_heads(t):
        return t.reshape(B, S, heads, dh).transpose(0, 2, 1, 3)

    q, k, v = split_heads(q), split_heads(k), split_heads(v)
    s = jnp.einsum("bhqd,bhkd->bhqk", q, k)   # 1/sqrt(dh) folded into Wq
    p = jax.nn.softmax(s, axis=-1)
    o = jnp.einsum("bhqk,bhkd->bhqd", p, v)
    o = o.transpose(0, 2, 1, 3).reshape(B * S, hidden)
    return (o @ Wo).reshape(B, S, D)


if __name__ == "__main__":
    heads, dims, hidden_dims = 4, 32, 32
    B, S = 2, 8

    key = jax.random.PRNGKey(0)
    kx, kp = jax.random.split(key)
    x = jax.random.normal(kx, (B, S, dims), dtype=jnp.float32)
    params = init_params(kp, dims, hidden_dims, heads)

    ref = mhsa_reference(x, params, heads)

    # Strict parity path: f32 compute, exact reciprocal.
    out_f32 = mhsa_forward(x, params, heads, compute_dtype=jnp.float32,
                           approx_recip=False)
    out_f32 = jax.block_until_ready(out_f32)
    assert out_f32.shape == (B, S, dims)
    assert jnp.all(jnp.isfinite(out_f32))
    assert jnp.allclose(out_f32, ref, atol=2e-2, rtol=2e-2)

    # Default performance path: bf16 compute (full MXU rate), approx recip.
    out_bf16 = mhsa_forward(x, params, heads)
    out_bf16 = jax.block_until_ready(out_bf16)
    assert out_bf16.shape == (B, S, dims)
    out_bf16_f32 = out_bf16.astype(jnp.float32)
    assert jnp.all(jnp.isfinite(out_bf16_f32))
    assert jnp.allclose(out_bf16_f32, ref, atol=1e-1, rtol=1e-1)

    print("KERNEL_OK")
</pallas_src>

<mosaic_0001>
module attributes {stable_mosaic.version = 11 : i64} {
  func.func @_matmul_kernel(%arg0: i32, %arg1: i32, %arg2: i32, %arg3: memref<16x32xf32, #tpu.memory_space<vmem>>, %arg4: memref<32x96xf32, #tpu.memory_space<vmem>>, %arg5: memref<16x96xf32, #tpu.memory_space<vmem>>, %arg6: memref<16x96xf32, #tpu.memory_space<vmem>>) attributes {dimension_semantics = [#tpu.dimension_semantics<parallel>, #tpu.dimension_semantics<parallel>, #tpu.dimension_semantics<arbitrary>], iteration_bounds = array<i64: 1, 1, 1>, scalar_prefetch = 0 : i64, scratch_operands = 1 : i64, tpu.core_type = #tpu.core_type<tc>, window_params = [{transform_indices = @transform_0, window_bounds = array<i64: 16, 32>}, {transform_indices = @transform_1, window_bounds = array<i64: 32, 96>}, {transform_indices = @transform_2, window_bounds = array<i64: 16, 96>}]} {
    %c0_i32 = arith.constant 0 : i32
    %0 = arith.cmpi eq, %arg2, %c0_i32 : i32
    %1 = arith.extui %0 : i1 to i32
    %c0_i32_0 = arith.constant 0 : i32
    %2 = arith.cmpi ne, %1, %c0_i32_0 : i32
    scf.if %2 {
      %cst_10 = arith.constant 0.000000e+00 : f32
      %12 = vector.broadcast %cst_10 : f32 to vector<16x96xf32>
      %c0_11 = arith.constant 0 : index
      %c0_12 = arith.constant 0 : index
      %13 = vector.load %arg6[%c0_11, %c0_12] : memref<16x96xf32, #tpu.memory_space<vmem>>, vector<16x96xf32>
      tpu.vector_store %arg6[%c0_11, %c0_12], %12 {strides = array<i32>} : memref<16x96xf32, #tpu.memory_space<vmem>>, vector<16x96xf32>,
    } else {
    }
    %c0 = arith.constant 0 : index
    %c0_1 = arith.constant 0 : index
    %3 = vector.load %arg6[%c0, %c0_1] : memref<16x96xf32, #tpu.memory_space<vmem>>, vector<16x96xf32>
    %c0_2 = arith.constant 0 : index
    %c0_3 = arith.constant 0 : index
    %4 = vector.load %arg3[%c0_2, %c0_3] : memref<16x32xf32, #tpu.memory_space<vmem>>, vector<16x32xf32>
    %c0_4 = arith.constant 0 : index
    %c0_5 = arith.constant 0 : index
    %5 = vector.load %arg4[%c0_4, %c0_5] : memref<32x96xf32, #tpu.memory_space<vmem>>, vector<32x96xf32>
    %cst = arith.constant dense<0.000000e+00> : vector<16x96xf32>
    %6 = tpu.matmul %4, %5, %cst {dimension_numbers = #tpu.dot_dimension_numbers<[1], [0], [0], [1], [0, 0, 1, 1], [], []>} : vector<16x32xf32>, vector<32x96xf32>, vector<16x96xf32> -> vector<16x96xf32>
    %7 = arith.addf %3, %6 : vector<16x96xf32>
    %c0_6 = arith.constant 0 : index
    %c0_7 = arith.constant 0 : index
    %8 = vector.load %arg6[%c0_6, %c0_7] : memref<16x96xf32, #tpu.memory_space<vmem>>, vector<16x96xf32>
    tpu.vector_store %arg6[%c0_6, %c0_7], %7 {strides = array<i32>} : memref<16x96xf32, #tpu.memory_space<vmem>>, vector<16x96xf32>,
    %c0_i32_8 = arith.constant 0 : i32
    %9 = arith.cmpi eq, %arg2, %c0_i32_8 : i32
    %10 = arith.extui %9 : i1 to i32
    %c0_i32_9 = arith.constant 0 : i32
    %11 = arith.cmpi ne, %10, %c0_i32_9 : i32
    scf.if %11 {
      %c0_10 = arith.constant 0 : index
      %c0_11 = arith.constant 0 : index
      %12 = vector.load %arg6[%c0_10, %c0_11] : memref<16x96xf32, #tpu.memory_space<vmem>>, vector<16x96xf32>
      %c0_12 = arith.constant 0 : index
      %c0_13 = arith.constant 0 : index
      %13 = vector.load %arg5[%c0_12, %c0_13] : memref<16x96xf32, #tpu.memory_space<vmem>>, vector<16x96xf32>
      tpu.vector_store %arg5[%c0_12, %c0_13], %12 {strides = array<i32>} : memref<16x96xf32, #tpu.memory_space<vmem>>, vector<16x96xf32>,
    } else {
    }
    return
  }
  func.func @transform_0(%arg0: i32, %arg1: i32, %arg2: i32) -> (i32, i32) {
    %c0_i32 = arith.constant 0 : i32
    return %arg0, %arg2 : i32, i32
  }
  func.func @transform_1(%arg0: i32, %arg1: i32, %arg2: i32) -> (i32, i32) {
    %c0_i32 = arith.constant 0 : i32
    return %arg2, %arg1 : i32, i32
  }
  func.func @transform_2(%arg0: i32, %arg1: i32, %arg2: i32) -> (i32, i32) {
    %c0_i32 = arith.constant 0 : i32
    return %arg0, %arg1 : i32, i32
  }
}

</mosaic_0001>

<bundles_post_ra>
// kernel: tpu_custom_call.1
= control target key start
LH: loop header
LB: loop body
LE: loop exit
PB: predicated region body
PF: predicated region fallthrough
CT: control target
= control target key end

     0   :  { %7 = vsyncpa [#allocation4], 0  ;;  %s256_s0 = inlined_call_operand.hbm [shape: f32[16,32], index: 0, kind: input, shape index: {}]   ;;  %s257_s1 = inlined_call_operand.hbm [shape: f32[32,96], index: 1, kind: input, shape index: {}]   ;;  %s258_s2 = inlined_call_operand.hbm [shape: f32[16,96], index: 2, kind: output, shape index: {}]  }
   0x1   :  { %8 = vsyncpa [#allocation7], 0 }
   0x2   :  { %9 = vsyncpa [#allocation5], 0  ;;  %s14_s11 = sshll.u32 %s256_s0, 4  ;;  %s211_s12 = smov [#allocation3]   ;;  %s15_s11 = int_to_ptr.hbm [resolvable:$true] %s14_s11 }
   0x3   :  { %s16_s13 = sshll.u32 %s211_s12, 4  ;;  %s27_s16 = sshll.u32 %s257_s1, 4  ;;  %s17_s13 = int_to_ptr.vmem [resolvable:$true] %s16_s13  ;;  %s28_s16 = int_to_ptr.hbm [resolvable:$true] %s27_s16 }
   0x4   :  { %s212_s17 = smov 128   ;;  %s213_s18 = smov 8  }
   0x5   :  { %22 = dma.hbm_to_vmem [thread:$0]  %s15_s11, 256, %s17_s13, [#allocation4], %s212_s17, %s212_s17, %s213_s18  }
   0x6   :  { %s214_s19 = smov [#allocation6]  }
   0x7   :  { %s29_s20 = sshll.u32 %s214_s19, 4  ;;  %s30_s20 = int_to_ptr.vmem [resolvable:$true] %s29_s20 }
   0x8   :  { %35 = dma.hbm_to_vmem [thread:$0]  %s28_s16, 512, %s30_s20, [#allocation7], %s212_s17, %s212_s17, %s213_s18  }
   0x9   :  { %205 = dma.done.wait [#allocation4], 256  }
   0xa   :  { %206 = vsyncadd [#allocation4], 4294967040 }
   0xb   :  { %207 = dma.done.wait [#allocation7], 512  }
   0xc   :  { %208 = vsyncadd [#allocation7], 4294966784  ;;  %vm48_vm0 = vcmask 785408   ;;  %v215_v0 = vmov 0.0   ;;  %v58_v1 = vld [vmem:[#allocation6 + $0x18] sm:$0xff]  ;;  %v57_v2 = vld [vmem:[#allocation6 + $0x10] sm:$0xff] }
   0xd   :  { %49 = vst.msk [vmem:[#allocation2] sm:$0xff] %vm48_vm0, %v215_v0  ;;  %78 = vmatpush.msra.mxu0 %v58_v1  ;;  %123 = vmatpush.msra.mxu1 %v58_v1  ;;  %v56_v3 = vld [vmem:[#allocation6 + $0x8] sm:$0xff]  ;;  %v55_v4 = vld [vmem:[#allocation6] sm:$0xff]  ;;  %v53_v5 = vld [vmem:[#allocation3] sm:$0xff]  ;;  %vm59_vm1 = vcmask 261120   ;;  %s216_s0 = smov [#allocation8]  }
   0xe   :  { %50 = vst.msk [vmem:[#allocation2 + $0x8] sm:$0xff] %vm48_vm0, %v215_v0  ;;  %v54_v6 = vld [vmem:[#allocation3 + $0x8] sm:$0xff]  ;;  %s105_s1 = sshll.u32 %s216_s0, 4  ;;  %s107_s23 = sshll.u32 %s258_s2, 4  ;;  %s106_s1 = int_to_ptr.vmem [resolvable:$true] %s105_s1  ;;  %s108_s23 = int_to_ptr.hbm [resolvable:$true] %s107_s23 }
   0xf   :  { %79 = vmatpush.msra.mxu0 %v57_v2  ;;  %124 = vmatpush.msra.mxu1 %v57_v2 }
  0x11   :  { %80 = vmatpush.msra.mxu0 %v56_v3  ;;  %125 = vmatpush.msra.mxu1 %v56_v3 }
  0x13   :  { %81 = vmatpush.msra.mxu0 %v55_v4  ;;  %126 = vmatpush.msra.mxu1 %v55_v4 }
  0x14   :  { %121 = vmatmul.msk.f32.vlgmr.msra.gmra.mxu0 %vm59_vm1, %v53_v5  ;;  %122 = vmatmul.msk.f32.vlgmr.msra.gmra.mxu1 %vm59_vm1, %v54_v6  ;;  %v51_v7 = vld [vmem:[#allocation2] sm:$0xff] }
  0x15   :  { %v52_v8 = vld [vmem:[#allocation2 + $0x8] sm:$0xff] }
  0x91   :  { %v83_v9 = vpop.f32.mrf.mxu0  ;;  %v86_v10 = vpop.f32.mrf.mxu1 }
  0x92   :  { %v89_v11 = vadd.f32 %v83_v9, %v51_v7  ;;  %v90_v12 = vadd.f32 %v86_v10, %v52_v8 }
  0x94   :  { %92 = vst.msk [vmem:[#allocation2] sm:$0xff] %vm48_vm0, %v89_v11 }
  0x95   :  { %93 = vst.msk [vmem:[#allocation2 + $0x8] sm:$0xff] %vm48_vm0, %v90_v12 }
  0x9b   :  { %v97_v13 = vld [vmem:[#allocation2] sm:$0xff] }
  0x9c   :  { %v98_v14 = vld [vmem:[#allocation2 + $0x8] sm:$0xff]  ;;  %99 = vst.msk [vmem:[#allocation8] sm:$0xff] %vm48_vm0, %v97_v13 }
  0x9d   :  { %100 = vst.msk [vmem:[#allocation8 + $0x8] sm:$0xff] %vm48_vm0, %v98_v14 }
  0x9e   :  { %113 = dma.vmem_to_hbm [thread:$0]  %s106_s1, 256, %s108_s23, [#allocation5], %s212_s17, %s212_s17, %s213_s18  }
  0x9f   :  { %209 = dma.done.wait [#allocation5], 256  }
  0xa0   :  { %210 = vsyncadd [#allocation5], 4294967040 }
  0xa1   :  { %118 = vsyncpa [#allocation4], 1 }
  0xa2   :  { %119 = vsyncpa [#allocation7], 1 }
  0xa3   :  { %120 = vsyncpa [#allocation5], 1 }

</bundles_post_ra>
